<compile_context>
chip_gen: v7x
topology: tpu7x:2x2x1
jax: 0.10.0
libtpu: 0.0.40
codegen_flags: <defaults>
</compile_context>

<pallas_src>
import jax
import jax.numpy as jnp
from jax import lax
from jax.experimental import pallas as pl
from jax.experimental.pallas import tpu as pltpu


_SUB = 256        # rows per in-kernel sub-chunk (bounds vreg live ranges)
_MAX_TILE = 2048  # per-tile row cap (VMEM stays tiny on all of v5e/v6e/v7x)


def _round_up(n, m):
    return ((n + m - 1) // m) * m


def _pick_tile_b(B):
    """Pick the batch-tile size.

    Fewest grid steps possible (each step costs ~0.35us of pipeline
    overhead); tiles above _SUB rows are multiples of _SUB so the in-kernel
    sub-chunk loop divides evenly; >= 2 tiles only for very large batches so
    v7x's two TensorCores both get work via dimension_semantics=("parallel",).
    """
    if B <= _SUB:
        return _round_up(B, 8)          # f32 sublane tile is 8 rows
    tile = _round_up(B, _SUB)
    if tile <= _MAX_TILE:
        return tile                     # single grid step
    n_tiles = max(2, pl.cdiv(B, _MAX_TILE))
    return _round_up(pl.cdiv(B, n_tiles), _SUB)


def _make_kernel(tile_b):
    sub = min(tile_b, _SUB)
    nc = tile_b // sub                  # tile_b is a multiple of sub

    def kernel(x_ref, w1_ref, b1_ref, w2_ref, b2_ref, o_ref):
        # Parameters are tiny; load once per tile (hoisted out of the loop).
        w1 = w1_ref[...]
        b1 = b1_ref[...]
        w2 = w2_ref[...]
        b2 = b2_ref[...]

        def chunk(row):
            xb = x_ref[pl.ds(row, sub), :]
            # Layer 1: MXU matmul with f32 accumulation, bias + ReLU on VPU.
            h = jnp.dot(xb, w1, preferred_element_type=jnp.float32)
            h = jnp.maximum(h + b1, 0.0)
            # Layer 2: 3-wide action head, written directly (masked vst).
            out = jnp.dot(h, w2, preferred_element_type=jnp.float32) + b2
            o_ref[pl.ds(row, sub), :] = out.astype(o_ref.dtype)

        if nc == 1:
            chunk(0)
        else:
            def body(i, carry):
                chunk(pl.multiple_of(i * sub, sub))
                return carry
            lax.fori_loop(0, nc, body, 0, unroll=True)

    return kernel


def linear_qnet_forward(x, w1, b1, w2, b2):
    """Fused 2-layer MLP forward pass as a single batch-tiled Pallas kernel.

    x : [B, input_size]   float32
    w1: [input_size, H]   float32   (transposed PyTorch linear1.weight)
    b1: [1, H]            float32
    w2: [H, output_size]  float32   (transposed PyTorch linear2.weight)
    b2: [1, output_size]  float32
    returns [B, output_size] float32
    """
    B, in_size = x.shape
    H = w1.shape[1]
    out_size = w2.shape[1]

    tile_b = _pick_tile_b(B)
    grid = (pl.cdiv(B, tile_b),)

    # Advisory cost estimate (real, unpadded traffic) so XLA schedules the
    # custom call sensibly inside a larger jitted training step.
    flops = 2 * B * (in_size * H + H * out_size)
    bytes_accessed = 4 * (B * in_size                    # x
                          + in_size * H + H              # w1, b1
                          + H * out_size + out_size      # w2, b2
                          + B * out_size)                # out
    cost = pl.CostEstimate(flops=flops, transcendentals=0,
                           bytes_accessed=bytes_accessed)

    def _resident(a):
        n = a.ndim
        return pl.BlockSpec(a.shape, lambda i, n=n: (0,) * n)

    return pl.pallas_call(
        _make_kernel(tile_b),
        out_shape=jax.ShapeDtypeStruct((B, out_size), jnp.float32),
        grid=grid,
        in_specs=[
            pl.BlockSpec((tile_b, in_size), lambda i: (i, 0)),   # x: batch-tiled
            _resident(w1),
            _resident(b1),
            _resident(w2),
            _resident(b2),
        ],
        out_specs=pl.BlockSpec((tile_b, out_size), lambda i: (i, 0)),
        compiler_params=pltpu.CompilerParams(
            # Batch tiles are independent -> shard across TensorCores on v7x.
            dimension_semantics=("parallel",),
        ),
        cost_estimate=cost,
    )(x, w1, b1, w2, b2)


def init_params(key, input_size, hidden_size, output_size):
    """Deterministic init matching PyTorch nn.Linear default:
    U(-1/sqrt(fan_in), 1/sqrt(fan_in)) for both weight and bias.
    Weights are stored pre-transposed ([in, out]) and biases as [1, out] rows
    — i.e. all one-time layout prep lives here, not in the forward wrapper."""
    k1, k2, k3, k4 = jax.random.split(key, 4)
    bound1 = 1.0 / jnp.sqrt(jnp.float32(input_size))
    bound2 = 1.0 / jnp.sqrt(jnp.float32(hidden_size))
    w1 = jax.random.uniform(k1, (input_size, hidden_size), jnp.float32,
                            minval=-bound1, maxval=bound1)
    b1 = jax.random.uniform(k2, (1, hidden_size), jnp.float32,
                            minval=-bound1, maxval=bound1)
    w2 = jax.random.uniform(k3, (hidden_size, output_size), jnp.float32,
                            minval=-bound2, maxval=bound2)
    b2 = jax.random.uniform(k4, (1, output_size), jnp.float32,
                            minval=-bound2, maxval=bound2)
    return w1, b1, w2, b2


def _reference(x, w1, b1, w2, b2):
    return jnp.maximum(x @ w1 + b1, 0.0) @ w2 + b2


# TODO(synk): Linear_QNet.save() (torch.save checkpoint I/O) is host-side
# file I/O with no kernel equivalent; not implemented.

if __name__ == "__main__":
    # Snake-game Q-net sizes: 11 state features, 32 hidden, 3 actions.
    input_size, hidden_size, output_size = 11, 32, 3

    key = jax.random.PRNGKey(0)
    kx, kp, kx2 = jax.random.split(key, 3)
    w1, b1, w2, b2 = init_params(kp, input_size, hidden_size, output_size)

    # Small single-step inference batch (as in the game loop).
    batch = 8
    x = jax.random.normal(kx, (batch, input_size), jnp.float32)
    out = linear_qnet_forward(x, w1, b1, w2, b2)
    out = jax.block_until_ready(out)
    assert out.shape == (batch, output_size)
    assert jnp.allclose(out, _reference(x, w1, b1, w2, b2),
                        atol=1e-4, rtol=1e-4)

    # Replay-buffer-sized ragged batch: exercises the partial edge block
    # (no wrapper padding of x, no output slice).
    batch2 = 300
    x2 = jax.random.normal(kx2, (batch2, input_size), jnp.float32)
    out2 = linear_qnet_forward(x2, w1, b1, w2, b2)
    out2 = jax.block_until_ready(out2)
    assert out2.shape == (batch2, output_size)
    assert jnp.allclose(out2, _reference(x2, w1, b1, w2, b2),
                        atol=1e-4, rtol=1e-4)

    print("KERNEL_OK")
</pallas_src>

<mosaic_0001>
module attributes {stable_mosaic.version = 11 : i64} {
  func.func @kernel(%arg0: i32, %arg1: memref<8x11xf32, #tpu.memory_space<vmem>>, %arg2: memref<11x32xf32, #tpu.memory_space<vmem>>, %arg3: memref<1x32xf32, #tpu.memory_space<vmem>>, %arg4: memref<32x3xf32, #tpu.memory_space<vmem>>, %arg5: memref<1x3xf32, #tpu.memory_space<vmem>>, %arg6: memref<8x3xf32, #tpu.memory_space<vmem>>) attributes {dimension_semantics = [#tpu.dimension_semantics<parallel>], iteration_bounds = array<i64: 1>, scalar_prefetch = 0 : i64, scratch_operands = 0 : i64, tpu.core_type = #tpu.core_type<tc>, window_params = [{transform_indices = @transform_0, window_bounds = array<i64: 8, 11>}, {pipeline_mode = #tpu.pipeline_mode<synchronous>, transform_indices = @transform_1, window_bounds = array<i64: 11, 32>}, {pipeline_mode = #tpu.pipeline_mode<synchronous>, transform_indices = @transform_2, window_bounds = array<i64: 1, 32>}, {pipeline_mode = #tpu.pipeline_mode<synchronous>, transform_indices = @transform_3, window_bounds = array<i64: 32, 3>}, {pipeline_mode = #tpu.pipeline_mode<synchronous>, transform_indices = @transform_4, window_bounds = array<i64: 1, 3>}, {transform_indices = @transform_5, window_bounds = array<i64: 8, 3>}]} {
    %c0 = arith.constant 0 : index
    %c0_0 = arith.constant 0 : index
    %0 = vector.load %arg2[%c0, %c0_0] : memref<11x32xf32, #tpu.memory_space<vmem>>, vector<11x32xf32>
    %c0_1 = arith.constant 0 : index
    %c0_2 = arith.constant 0 : index
    %1 = vector.load %arg3[%c0_1, %c0_2] : memref<1x32xf32, #tpu.memory_space<vmem>>, vector<1x32xf32>
    %c0_3 = arith.constant 0 : index
    %c0_4 = arith.constant 0 : index
    %2 = vector.load %arg4[%c0_3, %c0_4] : memref<32x3xf32, #tpu.memory_space<vmem>>, vector<32x3xf32>
    %c0_5 = arith.constant 0 : index
    %c0_6 = arith.constant 0 : index
    %3 = vector.load %arg5[%c0_5, %c0_6] : memref<1x3xf32, #tpu.memory_space<vmem>>, vector<1x3xf32>
    %c0_7 = arith.constant 0 : index
    %c0_8 = arith.constant 0 : index
    %4 = vector.load %arg1[%c0_7, %c0_8] : memref<8x11xf32, #tpu.memory_space<vmem>>, vector<8x11xf32>
    %cst = arith.constant dense<0.000000e+00> : vector<8x32xf32>
    %5 = tpu.matmul %4, %0, %cst {dimension_numbers = #tpu.dot_dimension_numbers<[1], [0], [0], [1], [0, 0, 1, 1], [], []>} : vector<8x11xf32>, vector<11x32xf32>, vector<8x32xf32> -> vector<8x32xf32>
    %6 = vector.broadcast %1 : vector<1x32xf32> to vector<8x32xf32>
    %7 = arith.addf %5, %6 : vector<8x32xf32>
    %cst_9 = arith.constant 0.000000e+00 : f32
    %8 = vector.broadcast %cst_9 : f32 to vector<8x32xf32>
    %9 = arith.maximumf %7, %8 : vector<8x32xf32>
    %cst_10 = arith.constant dense<0.000000e+00> : vector<8x3xf32>
    %10 = tpu.matmul %9, %2, %cst_10 {dimension_numbers = #tpu.dot_dimension_numbers<[1], [0], [0], [1], [0, 0, 1, 1], [], []>} : vector<8x32xf32>, vector<32x3xf32>, vector<8x3xf32> -> vector<8x3xf32>
    %11 = vector.broadcast %3 : vector<1x3xf32> to vector<8x3xf32>
    %12 = arith.addf %10, %11 : vector<8x3xf32>
    %c0_11 = arith.constant 0 : index
    %c0_12 = arith.constant 0 : index
    %13 = vector.load %arg6[%c0_11, %c0_12] : memref<8x3xf32, #tpu.memory_space<vmem>>, vector<8x3xf32>
    tpu.vector_store %arg6[%c0_11, %c0_12], %12 {strides = array<i32>} : memref<8x3xf32, #tpu.memory_space<vmem>>, vector<8x3xf32>,
    return
  }
  func.func @transform_0(%arg0: i32) -> (i32, i32) {
    %c0_i32 = arith.constant 0 : i32
    %c0_i32_0 = arith.constant 0 : i32
    return %arg0, %c0_i32 : i32, i32
  }
  func.func @transform_1(%arg0: i32) -> (i32, i32) {
    %c0_i32 = arith.constant 0 : i32
    %c0_i32_0 = arith.constant 0 : i32
    %c0_i32_1 = arith.constant 0 : i32
    return %c0_i32, %c0_i32_0 : i32, i32
  }
  func.func @transform_2(%arg0: i32) -> (i32, i32) {
    %c0_i32 = arith.constant 0 : i32
    %c0_i32_0 = arith.constant 0 : i32
    %c0_i32_1 = arith.constant 0 : i32
    return %c0_i32, %c0_i32_0 : i32, i32
  }
  func.func @transform_3(%arg0: i32) -> (i32, i32) {
    %c0_i32 = arith.constant 0 : i32
    %c0_i32_0 = arith.constant 0 : i32
    %c0_i32_1 = arith.constant 0 : i32
    return %c0_i32, %c0_i32_0 : i32, i32
  }
  func.func @transform_4(%arg0: i32) -> (i32, i32) {
    %c0_i32 = arith.constant 0 : i32
    %c0_i32_0 = arith.constant 0 : i32
    %c0_i32_1 = arith.constant 0 : i32
    return %c0_i32, %c0_i32_0 : i32, i32
  }
  func.func @transform_5(%arg0: i32) -> (i32, i32) {
    %c0_i32 = arith.constant 0 : i32
    %c0_i32_0 = arith.constant 0 : i32
    return %arg0, %c0_i32 : i32, i32
  }
}

</mosaic_0001>

<bundles_post_ra>
// kernel: tpu_custom_call.1
= control target key start
LH: loop header
LB: loop body
LE: loop exit
PB: predicated region body
PF: predicated region fallthrough
CT: control target
= control target key end

     0   :  { %vm39_vm0 = vcmask 1042432   ;;  %v245_v0 = vmov 0.0|0.0   ;;  %vm246_vm1 = vmmov 1   ;;  %vm247_vm3 = vmmov 0   ;;  %s309_s1 = inlined_call_operand.vmem [shape: f32[11,32], index: 1, kind: input, shape index: {}]   ;;  %s310_s3 = inlined_call_operand.vmem [shape: f32[32,3], index: 3, kind: input, shape index: {}]   ;;  %s311_s0 = inlined_call_operand.vmem [shape: f32[8,11], index: 0, kind: input, shape index: {}]   ;;  %s312_s2 = inlined_call_operand.vmem [shape: f32[1,32], index: 2, kind: input, shape index: {}]   ;;  %s313_s4 = inlined_call_operand.vmem [shape: f32[1,3], index: 4, kind: input, shape index: {}]   ;;  %s314_s5 = inlined_call_operand.vmem [shape: f32[8,3], index: 5, kind: output, shape index: {}]  }
   0x1   :  { %231 = vmatprep.subr.bf16.mxu0 %v245_v0  ;;  %v20_v1 = vld [vmem:[%s309_s1] sm:$0xff]  ;;  %v21_v2 = vld [vmem:[%s309_s1 + $0x8] sm:$0x7]  ;;  %vm233_vm2 = vmpackc.low %vm39_vm0, %vm246_vm1  ;;  %235 = vmatprep.subr.bf16.mxu1 %v245_v0  ;;  %v248_v4 = vmov 0.0   ;;  %vm35_vm4 = vcmask 89088   ;;  %vm120_vm5 = vcmask 261120  }
   0x2   :  { %v232_v3 = vpack.c.bf16 %v21_v2, %v20_v1  ;;  %217 = vmatprep.mubr.msk.f32.mxu0 %vm247_vm3, %v248_v4  ;;  %v23_v5 = vld [vmem:[%s310_s3] sm:$0xff]  ;;  %v24_v6 = vld [vmem:[%s310_s3 + $0x8] sm:$0xff]  ;;  %228 = vmatprep.mubr.msk.f32.mxu1 %vm247_vm3, %v248_v4  ;;  %v25_v9 = vld [vmem:[%s310_s3 + $0x10] sm:$0xff]  ;;  %vm194_vm6 = vcmask 23552  }
   0x3   :  { %v236_v7 = vpack.c.bf16 %v24_v6, %v23_v5  ;;  %v28_v8 = vld [vmem:[%s311_s0] sm:$0xff]  ;;  %v26_v10 = vld [vmem:[%s310_s3 + $0x18] sm:$0xff] }
   0x4   :  { %234 = vmatpush3.bf16.msk.msra.mxu0 %vm233_vm2, %v232_v3  ;;  %v239_v11 = vpack.c.bf16 %v26_v10, %v25_v9  ;;  %v200_v12 = vld [vmem:[%s312_s2] ss:$0 sm:$0xff] }
   0x5   :  { %237 = vmatpush3.bf16.msra.mxu1 %v236_v7  ;;  %v203_v17 = vld [vmem:[%s313_s4] ss:$0 sm:$0xff] }
   0x6   :  { %238 = vmatprep.subr.bf16.mxu1 %v245_v0 }
   0x7   :  { %218 = vmatmul.mubr.msk.f32.vlgmr.msra.gmra.mrb[0].mxu0 %vm35_vm4, %v28_v8 }
   0x9   :  { %240 = vmatpush3.bf16.msra.mxu1 %v239_v11 }
  0xda   :  { %v109_v13 = vpop.f32.mrb[0].mxu0 }
  0xdb   :  { %v110_v14 = vadd.f32 %v200_v12, %v109_v13  ;;  %v219_v15 = vpop.f32.mrb[1].mxu0 }
  0xdd   :  { %v113_v16 = vmax.f32 %v110_v14, 0.0 }
  0xdf   :  { %229 = vmatmul.mubr.msk.f32.vlgmr.msra.gmra.mrb[0].mxu1 %vm120_vm5, %v113_v16 }
 0x1b2   :  { %v190_v18 = vpop.f32.mrb[0].mxu1 }
 0x1b3   :  { %v191_v19 = vadd.f32 %v203_v17, %v190_v18  ;;  %v230_v20 = vpop.f32.mrb[1].mxu1 }
 0x1b5   :  { %195 = vst.msk [vmem:[%s314_s5] sm:$0xff] %vm194_vm6, %v191_v19 }

</bundles_post_ra>
